<compile_context>
chip_gen: v6e
topology: v6e:2x2x1
jax: 0.10.0
libtpu: 0.0.40
codegen_flags: <defaults>
</compile_context>

<pallas_src>
import jax
import jax.numpy as jnp
import numpy as np
from jax.experimental import pallas as pl
from jax.experimental.pallas import tpu as pltpu


def _round_up(a, b):
    return (a + b - 1) // b * b


def _gemm_bias_kernel(w_ref, p_ref, b_ref, o_ref, acc_ref):
    # w_ref:   (TC, TK)  weight^T tile (compute dtype)
    # p_ref:   (TK, TM)  im2col patches^T tile (compute dtype)
    # b_ref:   (TC, 1)   bias (f32), broadcast along lanes
    # o_ref:   (TC, TM)  output tile (lane-dense along M)
    # acc_ref: (TC, TM)  f32 accumulator scratch (lives across the K axis)
    @pl.when(pl.program_id(2) == 0)
    def _():
        acc_ref[...] = jnp.zeros_like(acc_ref)

    acc_ref[...] += jnp.dot(w_ref[...], p_ref[...],
                            preferred_element_type=jnp.float32)

    @pl.when(pl.program_id(2) == pl.num_programs(2) - 1)
    def _():
        o_ref[...] = (acc_ref[...] + b_ref[...]).astype(o_ref.dtype)


def reflect_conv_forward(x_nchw, weight, bias, *, kernel_size=4, stride=2, pad=1,
                         compute_dtype=jnp.bfloat16):
    """ReflectionPad2d(pad) followed by Conv2d(kernel_size, stride, padding=0).

    x_nchw : (N, Cin, H, W)
    weight : (Cout, Cin, KH, KW)   PyTorch OIHW layout
    bias   : (Cout,)
    returns: (N, Cout, Ho, Wo) in x_nchw.dtype

    compute_dtype=bf16 quantizes inputs/weights (f32 accumulation); pass
    compute_dtype=jnp.float32 for bit-closeness to the PyTorch f32 module.
    """
    N, Cin, H, W = x_nchw.shape
    Cout = weight.shape[0]
    KH = KW = kernel_size
    S = stride
    if pad > 0 and (pad > H - 1 or pad > W - 1):
        raise ValueError(
            f"reflection pad={pad} requires pad <= H-1 and pad <= W-1 (H={H}, W={W})")

    Hp, Wp = H + 2 * pad, W + 2 * pad
    Ho = (Hp - KH) // S + 1
    Wo = (Wp - KW) // S + 1
    M = N * Ho * Wo
    Kdim = KH * KW * Cin
    out_dtype = x_nchw.dtype

    # ---- plain-JAX glue: cast FIRST, then reflection pad + im2col ----------
    xc = x_nchw.astype(compute_dtype)
    xp = jnp.pad(xc, ((0, 0), (0, 0), (pad, pad), (pad, pad)), mode="reflect")

    # im2col, transposed: P^T has shape (Kdim, M); K ordered (kh, kw, cin),
    # M ordered (n, ho, wo).  Only cheap major-dim transposes here.
    taps = []
    for kh in range(KH):
        for kw in range(KW):
            t = xp[:, :, kh:kh + S * (Ho - 1) + 1:S, kw:kw + S * (Wo - 1) + 1:S]
            taps.append(jnp.transpose(t, (1, 0, 2, 3)).reshape(Cin, M))
    patches_t = jnp.concatenate(taps, axis=0)                        # (Kdim, M)

    # weight^T: (Cout, Kdim) with the same (kh, kw, cin) K order.
    w_t = jnp.transpose(weight, (0, 2, 3, 1)).reshape(Cout, Kdim).astype(compute_dtype)

    # ---- tile sizes ---------------------------------------------------------
    cbytes = jnp.dtype(compute_dtype).itemsize
    obytes = jnp.dtype(out_dtype).itemsize

    # Cout is the SUBLANE axis now: pad only to 8, tile at most 256.
    if Cout <= 256:
        Cout_p = _round_up(Cout, 8)
        TC = Cout_p
    else:
        TC = 256
        Cout_p = _round_up(Cout, TC)

    # K: single block when it fits, otherwise 2048-wide blocks (keeps the
    # per-step footprint within v7x's 64 MiB VMEM for very large Cin).
    K_CAP = 2048
    if Kdim <= K_CAP:
        TK, Kp = Kdim, Kdim
    else:
        TK = K_CAP
        Kp = _round_up(Kdim, TK)
    nk = Kp // TK

    # M (lane axis): target ~2 MiB per patches block, multiple of 128, cap 2048.
    tm_target = max(128, ((2 * 1024 * 1024) // (TK * cbytes)) // 128 * 128)
    TM = min(_round_up(M, 128), min(tm_target, 2048))
    M_pad = _round_up(M, TM)
    nm, nc = M_pad // TM, Cout_p // TC
    # v7x megacore: keep >= 2 parallel grid steps whenever M allows it.
    if nm * nc == 1 and TM >= 256:
        TM = max(128, (TM // 2) // 128 * 128)
        M_pad = _round_up(M, TM)
        nm = M_pad // TM

    # ---- pad operands to the tiled shapes -----------------------------------
    if (Kp, M_pad) != (Kdim, M):
        patches_t = jnp.pad(patches_t, ((0, Kp - Kdim), (0, M_pad - M)))
    if (Cout_p, Kp) != (Cout, Kdim):
        w_t = jnp.pad(w_t, ((0, Cout_p - Cout), (0, Kp - Kdim)))
    b2d = jnp.pad(bias.astype(jnp.float32), (0, Cout_p - Cout)).reshape(Cout_p, 1)

    # ---- VMEM budget from the actual per-step footprint ---------------------
    vmem_bytes = (2 * (TC * TK + TK * TM) * cbytes   # double-buffered inputs
                  + 2 * TC * 1 * 4                   # bias block
                  + 2 * TC * TM * obytes             # double-buffered output
                  + TC * TM * 4)                     # f32 accumulator scratch
    vmem_limit = int(min(max(vmem_bytes * 2, 16 * 1024 * 1024),
                         64 * 1024 * 1024))          # <= v7x physical VMEM

    out = pl.pallas_call(
        _gemm_bias_kernel,
        out_shape=jax.ShapeDtypeStruct((Cout_p, M_pad), out_dtype),
        grid_spec=pltpu.PrefetchScalarGridSpec(
            num_scalar_prefetch=0,
            grid=(nm, nc, nk),
            in_specs=[
                pl.BlockSpec((TC, TK), lambda m, c, k: (c, k)),   # weight^T
                pl.BlockSpec((TK, TM), lambda m, c, k: (k, m)),   # patches^T
                pl.BlockSpec((TC, 1), lambda m, c, k: (c, 0)),    # bias
            ],
            out_specs=pl.BlockSpec((TC, TM), lambda m, c, k: (c, m)),
            scratch_shapes=[pltpu.VMEM((TC, TM), jnp.float32)],
        ),
        compiler_params=pltpu.CompilerParams(
            dimension_semantics=("parallel", "parallel", "arbitrary"),
            vmem_limit_bytes=vmem_limit,
        ),
    )(w_t, patches_t, b2d)

    # slice off padding; (Cout, M) -> (N, Cout, Ho, Wo) via a cheap major-dim swap
    out = out[:Cout, :M].reshape(Cout, N, Ho, Wo)
    return jnp.transpose(out, (1, 0, 2, 3))


if __name__ == "__main__":
    key = jax.random.PRNGKey(0)
    k1, k2, k3 = jax.random.split(key, 3)

    N, Cin, H, W = 2, 4, 16, 16
    Cout, K, S, P = 8, 4, 2, 1

    x = jax.random.normal(k1, (N, Cin, H, W), dtype=jnp.float32)

    # deterministic synthetic params (PyTorch Conv2d default-init-like bounds)
    fan_in = Cin * K * K
    bound = 1.0 / np.sqrt(fan_in)
    weight = jax.random.uniform(k2, (Cout, Cin, K, K), jnp.float32, -bound, bound)
    bias = jax.random.uniform(k3, (Cout,), jnp.float32, -bound, bound)

    out = reflect_conv_forward(x, weight, bias, kernel_size=K, stride=S, pad=P)
    out = jax.block_until_ready(out)

    # pure-JAX f32 reference: reflection pad + VALID conv
    xp = jnp.pad(x, ((0, 0), (0, 0), (P, P), (P, P)), mode="reflect")
    ref = jax.lax.conv_general_dilated(
        xp, weight, window_strides=(S, S), padding="VALID",
        dimension_numbers=("NCHW", "OIHW", "NCHW"))
    ref = ref + bias.reshape(1, Cout, 1, 1)

    Ho = (H + 2 * P - K) // S + 1
    assert out.shape == (N, Cout, Ho, Ho), out.shape
    # kernel uses bf16 operands with f32 accumulation -> bf16-appropriate tolerance
    np.testing.assert_allclose(np.asarray(out), np.asarray(ref), rtol=2e-2, atol=2e-2)
    print("KERNEL_OK")
</pallas_src>

<mosaic_0001>
module attributes {stable_mosaic.version = 11 : i64} {
  func.func @_gemm_bias_kernel(%arg0: i32, %arg1: i32, %arg2: i32, %arg3: memref<8x64xbf16, #tpu.memory_space<vmem>>, %arg4: memref<64x128xbf16, #tpu.memory_space<vmem>>, %arg5: memref<8x1xf32, #tpu.memory_space<vmem>>, %arg6: memref<8x128xf32, #tpu.memory_space<vmem>>, %arg7: memref<8x128xf32, #tpu.memory_space<vmem>>) attributes {dimension_semantics = [#tpu.dimension_semantics<parallel>, #tpu.dimension_semantics<parallel>, #tpu.dimension_semantics<arbitrary>], iteration_bounds = array<i64: 1, 1, 1>, scalar_prefetch = 0 : i64, scratch_operands = 1 : i64, tpu.core_type = #tpu.core_type<tc>, window_params = [{transform_indices = @transform_0, window_bounds = array<i64: 8, 64>}, {transform_indices = @transform_1, window_bounds = array<i64: 64, 128>}, {transform_indices = @transform_2, window_bounds = array<i64: 8, 1>}, {transform_indices = @transform_3, window_bounds = array<i64: 8, 128>}]} {
    %c0_i32 = arith.constant 0 : i32
    %0 = arith.cmpi eq, %arg2, %c0_i32 : i32
    %1 = arith.extui %0 : i1 to i32
    %c0_i32_0 = arith.constant 0 : i32
    %2 = arith.cmpi ne, %1, %c0_i32_0 : i32
    scf.if %2 {
      %cst_10 = arith.constant 0.000000e+00 : f32
      %12 = vector.broadcast %cst_10 : f32 to vector<8x128xf32>
      %c0_11 = arith.constant 0 : index
      %c0_12 = arith.constant 0 : index
      %13 = vector.load %arg7[%c0_11, %c0_12] : memref<8x128xf32, #tpu.memory_space<vmem>>, vector<8x128xf32>
      tpu.vector_store %arg7[%c0_11, %c0_12], %12 {strides = array<i32>} : memref<8x128xf32, #tpu.memory_space<vmem>>, vector<8x128xf32>,
    } else {
    }
    %c0 = arith.constant 0 : index
    %c0_1 = arith.constant 0 : index
    %3 = vector.load %arg7[%c0, %c0_1] : memref<8x128xf32, #tpu.memory_space<vmem>>, vector<8x128xf32>
    %c0_2 = arith.constant 0 : index
    %c0_3 = arith.constant 0 : index
    %4 = vector.load %arg3[%c0_2, %c0_3] : memref<8x64xbf16, #tpu.memory_space<vmem>>, vector<8x64xbf16>
    %c0_4 = arith.constant 0 : index
    %c0_5 = arith.constant 0 : index
    %5 = vector.load %arg4[%c0_4, %c0_5] : memref<64x128xbf16, #tpu.memory_space<vmem>>, vector<64x128xbf16>
    %cst = arith.constant dense<0.000000e+00> : vector<8x128xf32>
    %6 = tpu.matmul %4, %5, %cst {dimension_numbers = #tpu.dot_dimension_numbers<[1], [0], [0], [1], [0, 0, 1, 1], [], []>} : vector<8x64xbf16>, vector<64x128xbf16>, vector<8x128xf32> -> vector<8x128xf32>
    %7 = arith.addf %3, %6 : vector<8x128xf32>
    %c0_6 = arith.constant 0 : index
    %c0_7 = arith.constant 0 : index
    %8 = vector.load %arg7[%c0_6, %c0_7] : memref<8x128xf32, #tpu.memory_space<vmem>>, vector<8x128xf32>
    tpu.vector_store %arg7[%c0_6, %c0_7], %7 {strides = array<i32>} : memref<8x128xf32, #tpu.memory_space<vmem>>, vector<8x128xf32>,
    %c0_i32_8 = arith.constant 0 : i32
    %9 = arith.cmpi eq, %arg2, %c0_i32_8 : i32
    %10 = arith.extui %9 : i1 to i32
    %c0_i32_9 = arith.constant 0 : i32
    %11 = arith.cmpi ne, %10, %c0_i32_9 : i32
    scf.if %11 {
      %c0_10 = arith.constant 0 : index
      %c0_11 = arith.constant 0 : index
      %12 = vector.load %arg7[%c0_10, %c0_11] : memref<8x128xf32, #tpu.memory_space<vmem>>, vector<8x128xf32>
      %c0_12 = arith.constant 0 : index
      %c0_13 = arith.constant 0 : index
      %13 = vector.load %arg5[%c0_12, %c0_13] : memref<8x1xf32, #tpu.memory_space<vmem>>, vector<8x1xf32>
      %14 = vector.broadcast %13 : vector<8x1xf32> to vector<8x128xf32>
      %15 = arith.addf %12, %14 : vector<8x128xf32>
      %c0_14 = arith.constant 0 : index
      %c0_15 = arith.constant 0 : index
      %16 = vector.load %arg6[%c0_14, %c0_15] : memref<8x128xf32, #tpu.memory_space<vmem>>, vector<8x128xf32>
      tpu.vector_store %arg6[%c0_14, %c0_15], %15 {strides = array<i32>} : memref<8x128xf32, #tpu.memory_space<vmem>>, vector<8x128xf32>,
    } else {
    }
    return
  }
  func.func @transform_0(%arg0: i32, %arg1: i32, %arg2: i32) -> (i32, i32) {
    %c0_i32 = arith.constant 0 : i32
    return %arg1, %arg2 : i32, i32
  }
  func.func @transform_1(%arg0: i32, %arg1: i32, %arg2: i32) -> (i32, i32) {
    %c0_i32 = arith.constant 0 : i32
    return %arg2, %arg0 : i32, i32
  }
  func.func @transform_2(%arg0: i32, %arg1: i32, %arg2: i32) -> (i32, i32) {
    %c0_i32 = arith.constant 0 : i32
    %c0_i32_0 = arith.constant 0 : i32
    return %arg1, %c0_i32 : i32, i32
  }
  func.func @transform_3(%arg0: i32, %arg1: i32, %arg2: i32) -> (i32, i32) {
    %c0_i32 = arith.constant 0 : i32
    return %arg1, %arg0 : i32, i32
  }
}

</mosaic_0001>

<bundles_post_ra>
// kernel: tpu_custom_call.1
= control target key start
LH: loop header
LB: loop body
LE: loop exit
PB: predicated region body
PF: predicated region fallthrough
CT: control target
= control target key end

     0   :  { %8 = vsyncpa [#allocation4], 0  ;;  %s259_s0 = inlined_call_operand.vmem [shape: bf16[8,64], index: 0, kind: input, shape index: {}]   ;;  %s260_s1 = inlined_call_operand.hbm [shape: bf16[64,128], index: 1, kind: input, shape index: {}]   ;;  %s261_s2 = inlined_call_operand.vmem [shape: f32[8,1], index: 2, kind: input, shape index: {}]   ;;  %s262_s3 = inlined_call_operand.hbm [shape: f32[8,128], index: 3, kind: output, shape index: {}]  }
   0x1   :  { %9 = vsyncpa [#allocation5], 0  ;;  %s220_s12 = smov [#allocation3]  }
   0x2   :  { %s17_s13 = sshll.u32 %s220_s12, 4  ;;  %s18_s13 = int_to_ptr.vmem [resolvable:$true] %s17_s13 }
   0x3   :  { %s184_s14 = scalar_lea.vmem %s18_s13, 512  ;;  %p189_p1 = scmp.lt.s32.totalorder %s18_s13, %s18_s13 }
   0x4   :  { %p185_p0 = scmp.ne.s32.totalorder %s18_s13, %s184_s14  ;;  %p190_p2 = scmp.lt.s32.totalorder %s184_s14, %s184_s14 }
   0x6   :  { %p191_p3 = por %p190_p2, %p189_p1 }
   0x8   :  { %p192_p4 = pnand %p191_p3, %p185_p0 }
   0xa   :  { %195 = shalt.err (!%p192_p4)
}
   0xb   :  { %s221_s15 = smov 64   ;;  %s222_s16 = smov 4  }
   0xc   :  { %23 = dma.hbm_to_vmem [thread:$0]  %s260_s1, 512, %s18_s13, [#allocation4], %s221_s15, %s221_s15, %s222_s16  }
   0xd   :  { %216 = dma.done.wait [#allocation4], 512  }
   0xe   :  { %217 = vsyncadd [#allocation4], 4294966784  ;;  %v223_v0 = vmov 0.0   ;;  %vm224_vm0 = vmmov 0   ;;  %v225_v1 = vmov 0   ;;  %v172_v2 = vld [vmem:[#allocation3 + $0x18] sm:$0xff]  }
   0xf   :  { %152 = vmatprep.subr.bf16.mxu0 %v223_v0  ;;  %160 = vmatprep.mubr.msk.bf16.mxu0 %vm224_vm0, %v223_v0  ;;  %v173_v3 = vld [vmem:[#allocation3 + $0x10] sm:$0xff]   ;;  %v119_v4 = vld [vmem:[%s261_s2] sm:$0xff]  ;;  %v174_v5 = vld [vmem:[#allocation3 + $0x8] sm:$0xff]   ;;  %vm69_vm1 = vcmask 523264   ;;  %s226_s22 = smov [#allocation6]  }
  0x10   :  { %171 = vset.pattern.permute.xlu0 %v225_v1  ;;  %153 = vmatpush3.bf16.msra.mxu0 %v172_v2  ;;  %v175_v6 = vld [vmem:[#allocation3] sm:$0xff]   ;;  %s133_s23 = sshll.u32 %s226_s22, 4  ;;  %s134_s23 = int_to_ptr.vmem [resolvable:$true] %s133_s23 }
  0x11   :  { %154 = vmatprep.subr.bf16.mxu0 %v223_v0  ;;  %122 = vperm.xlu0 %171, %v119_v4   ;;  %v36_v7 = vld [vmem:[%s259_s0] sm:$0xf]  ;;  %s196_s2 = scalar_lea.vmem %s134_s23, 128  ;;  %p201_p6 = scmp.lt.s32.totalorder %s134_s23, %s134_s23 }
  0x12   :  { %p197_p5 = scmp.ne.s32.totalorder %s134_s23, %s196_s2  ;;  %p202_p7 = scmp.lt.s32.totalorder %s196_s2, %s196_s2 }
  0x14   :  { %155 = vmatpush3.bf16.msra.mxu0 %v173_v3  ;;  %p203_p8 = por %p202_p7, %p201_p6 }
  0x15   :  { %156 = vmatprep.subr.bf16.mxu0 %v223_v0 }
  0x16   :  { %p204_p9 = pnand %p203_p8, %p197_p5 }
  0x18   :  { %157 = vmatpush3.bf16.msra.mxu0 %v174_v5 }
  0x19   :  { %158 = vmatprep.subr.bf16.mxu0 %v223_v0 }
  0x1c   :  { %159 = vmatpush3.bf16.msra.mxu0 %v175_v6 }
  0x1f   :  { %161 = vmatmul.mubr.msk.bf16.vlgmr.msra.gmra.mxu0 %vm69_vm1, %v36_v7 }
  0x8c   :  { %v123_v8 = vpop.permute.xlu0 %122 }
  0xdf   :  { %v107_v9 = vpop.f32.mrf.mxu0 }
  0xe0   :  { %v125_v10 = vadd.f32 %v123_v8, %v107_v9 }
  0xe1   :  { %v162_v11 = vpop.f32.mrf.mxu0 }
  0xe2   :  { %126 = vst [vmem:[#allocation6] sm:$0xff] %v125_v10 }
  0xe3   :  { %v110_v12 = vpop.f32.mrf.mxu0 }
  0xe4   :  { %207 = shalt.err (!%p204_p9)
}
  0xe5   :  { %136 = dma.vmem_to_hbm [thread:$0]  %s134_s23, 128, %s262_s3, [#allocation5]   ;;  %v163_v13 = vpop.f32.mrf.mxu0 }
  0xe6   :  { %218 = dma.done.wait [#allocation5], 128  }
  0xe7   :  { %219 = vsyncadd [#allocation5], 4294967168 }
  0xe8   :  { %140 = vsyncpa [#allocation4], 1 }
  0xe9   :  { %141 = vsyncpa [#allocation5], 1 }

</bundles_post_ra>
